<compile_context>
chip_gen: v6e
topology: v6e:2x2x1
jax: 0.10.0
libtpu: 0.0.40
codegen_flags: <defaults>
</compile_context>

<pallas_src>
from functools import partial

import numpy as np
import jax
import jax.numpy as jnp
from jax.experimental import pallas as pl
from jax.experimental.pallas import tpu as pltpu


# ---------------------------------------------------------------------------
# Pallas kernel (fused charge+spin electronic embedding + residual)
# ---------------------------------------------------------------------------
def _combined_embedding_kernel(ez_ref, cc_ref, mc_ref, cs_ref, ms_ref, out_ref):
    """out = e_z + swish(h_q) + swish(h_s), h = coef @ M (bias folded into M).

    Packed layout: A = 128 // D atoms per 128-lane row.  cc/cs are compact
    per-atom coefficients (tile_rows, K) = [a_plus | a_minus | 1 | 0-pad];
    mc/ms are (K, 128) block-diagonal matrices carrying hv_plus / hv_minus and
    a final b2 row, so
        h[r, a*D+d] = a_plus[r,a]*hv_plus[d] + a_minus[r,a]*hv_minus[d] + b2[d]
    i.e. the expansion to the packed lane-dense layout (incl. bias) is a
    single tiny MXU matmul per embedding.
    """
    h_c = jnp.dot(cc_ref[...], mc_ref[...], preferred_element_type=jnp.float32)
    h_s = jnp.dot(cs_ref[...], ms_ref[...], preferred_element_type=jnp.float32)
    # swish; sigmoid (lax.logistic) takes the EUP path, leaving VALU slots free.
    out_ref[...] = (ez_ref[...]
                    + h_c * jax.nn.sigmoid(h_c)
                    + h_s * jax.nn.sigmoid(h_s))


# ---------------------------------------------------------------------------
# wrapper: folding, segment-sum pre-pass, packing, pallas_call
# ---------------------------------------------------------------------------
@partial(jax.jit,
         static_argnames=("n_mol", "n_atoms", "feat_dim", "atoms_per_row",
                          "tile_rows", "rows_pad"))
def _forward_impl(charge, spin, z, mol_id, params, *, n_mol, n_atoms, feat_dim,
                  atoms_per_row, tile_rows, rows_pad):
    D, A = feat_dim, atoms_per_row
    lane = A * D
    n_pad = rows_pad * A
    k_width = ((2 * A + 1 + 7) // 8) * 8          # contraction dim, padded to x8
    inv_sqrt_d = 1.0 / (D ** 0.5)

    # NuclearEmbedding: embedding-table lookup (XLA glue; tiny gather).
    e_z = jnp.take(params["emb"], z, axis=0).astype(jnp.float32)        # (N, D)

    eye_exp = jnp.repeat(jnp.eye(A, dtype=jnp.float32), D, axis=1)      # (A, lane)

    def fold_and_coeffs(psi, p):
        """Fold k/v/b2 into small operands; two-pass per-atom coefficient a_i."""
        psi = psi.reshape(-1).astype(jnp.float32)                       # (n_mol,)
        kp, km = p["k_plus"].reshape(D), p["k_minus"].reshape(D)
        vp, vm = p["v_plus"].reshape(D), p["v_minus"].reshape(D)
        wk = jnp.stack([p["W1"].T @ kp, p["W1"].T @ km], axis=1) * inv_sqrt_d  # (D,2)
        bk = jnp.stack([p["b1"] @ kp, p["b1"] @ km]) * inv_sqrt_d              # (2,)
        hv_p, hv_m = p["W2"] @ vp, p["W2"] @ vm                                # (D,)

        sel_atom = (psi >= 0.0)[mol_id]                                 # (N,)
        arg2 = e_z @ wk + bk                                            # (N, 2)
        arg = jnp.where(sel_atom, arg2[:, 0], arg2[:, 1])               # (N,)
        num = jax.nn.softplus(arg)                                      # logsumexp([0, arg])
        denom = jax.ops.segment_sum(num, mol_id, num_segments=n_mol)    # (n_mol,)
        a = psi[mol_id] * num / denom[mol_id]                           # (N,)
        a_plus = jnp.where(sel_atom, a, 0.0)
        a_minus = a - a_plus                                            # exactly one is nonzero

        pad = n_pad - n_atoms                                           # padded atoms -> a == 0
        coef = jnp.zeros((rows_pad, k_width), jnp.float32)
        coef = coef.at[:, 0:A].set(jnp.pad(a_plus, (0, pad)).reshape(rows_pad, A))
        coef = coef.at[:, A:2 * A].set(jnp.pad(a_minus, (0, pad)).reshape(rows_pad, A))
        coef = coef.at[:, 2 * A].set(1.0)                               # bias column

        m = jnp.zeros((k_width, lane), jnp.float32)
        m = m.at[0:A].set(eye_exp * jnp.tile(hv_p, A))
        m = m.at[A:2 * A].set(eye_exp * jnp.tile(hv_m, A))
        m = m.at[2 * A].set(jnp.tile(p["b2"].astype(jnp.float32), A))   # folded bias
        return coef, m

    coef_c, m_c = fold_and_coeffs(charge, params["charge"])
    coef_s, m_s = fold_and_coeffs(spin, params["spin"])

    # Residual base == e_z, presented as a lane-dense packed slab.
    ez_p = jnp.pad(e_z, ((0, n_pad - n_atoms), (0, 0))).reshape(rows_pad, lane)

    row_spec = lambda w: pl.BlockSpec((tile_rows, w), lambda i: (i, 0))
    const_spec = lambda shp: pl.BlockSpec(shp, lambda i: (0, 0))

    out_p = pl.pallas_call(
        _combined_embedding_kernel,
        out_shape=jax.ShapeDtypeStruct((rows_pad, lane), jnp.float32),
        grid=(rows_pad // tile_rows,),
        in_specs=[row_spec(lane),                 # packed e_z (residual base)
                  row_spec(k_width),              # charge coefficients (compact)
                  const_spec((k_width, lane)),    # charge hv/b2 block-diag matrix
                  row_spec(k_width),              # spin coefficients (compact)
                  const_spec((k_width, lane))],   # spin hv/b2 block-diag matrix
        out_specs=row_spec(lane),
        input_output_aliases={0: 0},              # write result in place of e_z slab
        compiler_params=pltpu.CompilerParams(
            dimension_semantics=("parallel",)),   # megacore sharding
    )(ez_p, coef_c, m_c, coef_s, m_s)

    return out_p.reshape(n_pad, D)[:n_atoms]


def combined_embedding_forward(charge, spin, z, num_atoms, params, feat_dim):
    """CombinedEmbedding.forward: returns (s_i, v_i)."""
    num_atoms_np = np.asarray(num_atoms)                     # host-side metadata
    n_mol = int(num_atoms_np.shape[0])
    n_atoms = int(num_atoms_np.sum())
    mol_id = jnp.asarray(np.repeat(np.arange(n_mol), num_atoms_np), dtype=jnp.int32)

    D = int(feat_dim)
    # atoms packed per 128-lane row (lane-dense output); graceful fallback A=1.
    A = 128 // D if (D < 128 and 128 % D == 0) else 1
    rows_raw = -(-n_atoms // A)
    tile_rows = min(1024, ((rows_raw + 7) // 8) * 8)
    rows_pad = ((rows_raw + tile_rows - 1) // tile_rows) * tile_rows

    s_i = _forward_impl(jnp.asarray(charge, jnp.float32),
                        jnp.asarray(spin, jnp.float32),
                        jnp.asarray(z, jnp.int32),
                        mol_id, params,
                        n_mol=n_mol, n_atoms=n_atoms, feat_dim=D,
                        atoms_per_row=A, tile_rows=tile_rows, rows_pad=rows_pad)
    v_i = jnp.zeros((n_atoms, D, 3), dtype=s_i.dtype)
    return s_i, v_i


# ---------------------------------------------------------------------------
# deterministic parameter init + pure-JAX reference
# ---------------------------------------------------------------------------
def init_params(key, feat_dim, max_z):
    def ee_params(k):
        ks = jax.random.split(k, 8)
        s = 1.0 / np.sqrt(feat_dim)
        return {
            "W1": jax.random.normal(ks[0], (feat_dim, feat_dim), jnp.float32) * s,
            "b1": jax.random.normal(ks[1], (feat_dim,), jnp.float32) * 0.1,
            "W2": jax.random.normal(ks[2], (feat_dim, feat_dim), jnp.float32) * s,
            "b2": jax.random.normal(ks[3], (feat_dim,), jnp.float32) * 0.1,
            # PyTorch inits these to zeros; use small random values for a
            # non-degenerate numerical test (shapes match nn.Parameter(feat_dim, 1)).
            "k_plus": jax.random.normal(ks[4], (feat_dim, 1), jnp.float32) * 0.5,
            "k_minus": jax.random.normal(ks[5], (feat_dim, 1), jnp.float32) * 0.5,
            "v_plus": jax.random.normal(ks[6], (feat_dim, 1), jnp.float32) * 0.5,
            "v_minus": jax.random.normal(ks[7], (feat_dim, 1), jnp.float32) * 0.5,
        }

    k_emb, k_q, k_s = jax.random.split(key, 3)
    return {
        "emb": jax.random.normal(k_emb, (max_z, feat_dim), jnp.float32) * 0.1,
        "charge": ee_params(k_q),
        "spin": ee_params(k_s),
    }


def _ee_ref(e_z, psi, num_atoms_np, p):
    D = e_z.shape[1]
    q = e_z @ p["W1"].T + p["b1"]
    outs, counter = [], 0
    for j, n in enumerate(num_atoms_np):
        mol_q = q[counter:counter + n]
        mp = float(psi[j])
        k = p["k_plus"] if mp >= 0 else p["k_minus"]
        v = p["v_plus"] if mp >= 0 else p["v_minus"]
        arg = (mol_q @ k).reshape(-1) / (D ** 0.5)
        num = jnp.logaddexp(0.0, arg)
        a = mp * num / num.sum()
        av = a.reshape(-1, 1) * v.reshape(1, -1)
        h = av @ p["W2"].T + p["b2"]
        outs.append(h * jax.nn.sigmoid(h))
        counter += int(n)
    return jnp.concatenate(outs, axis=0)


def _combined_ref(charge, spin, z, num_atoms_np, params):
    e_z = jnp.take(params["emb"], jnp.asarray(z, dtype=jnp.int32), axis=0)
    e_q = _ee_ref(e_z, np.asarray(charge).reshape(-1), num_atoms_np, params["charge"])
    e_s = _ee_ref(e_z, np.asarray(spin).reshape(-1), num_atoms_np, params["spin"])
    return e_z + e_q + e_s


if __name__ == "__main__":
    feat_dim = 32
    max_z = 20
    num_atoms = np.array([3, 5], dtype=np.int32)             # 2 molecules, 8 atoms total
    z = np.array([1, 6, 8, 1, 1, 7, 8, 6], dtype=np.int32)   # atomic numbers
    charge = jnp.array([1.0, -1.0], dtype=jnp.float32)       # exercise k_plus / k_minus
    spin = jnp.array([0.0, 2.0], dtype=jnp.float32)

    params = init_params(jax.random.PRNGKey(0), feat_dim, max_z)

    s_i, v_i = combined_embedding_forward(charge, spin, z, num_atoms, params, feat_dim)
    s_i = jax.block_until_ready(s_i)
    v_i = jax.block_until_ready(v_i)

    assert s_i.shape == (int(num_atoms.sum()), feat_dim)
    assert v_i.shape == (int(num_atoms.sum()), feat_dim, 3)

    s_ref = _combined_ref(charge, spin, z, num_atoms, params)
    np.testing.assert_allclose(np.asarray(s_i), np.asarray(s_ref), rtol=1e-4, atol=1e-4)
    np.testing.assert_array_equal(np.asarray(v_i), 0.0)

    print("KERNEL_OK")
</pallas_src>

<mosaic_0001>
module attributes {stable_mosaic.version = 11 : i64} {
  func.func private @main(%arg0: i32) attributes {dimension_semantics = [#tpu.dimension_semantics<core_parallel>], iteration_bounds = array<i64: 2>, tpu.core_type = #tpu.core_type<sc_scalar_subcore>, window_params = []} {
    return
  }
}

module attributes {stable_mosaic.version = 11 : i64} {
  func.func private @main(%arg0: i32) attributes {dimension_semantics = [#tpu.dimension_semantics<core_parallel>], iteration_bounds = array<i64: 2>, tpu.core_type = #tpu.core_type<sc_scalar_subcore>, window_params = []} {
    return
  }
}

module attributes {stable_mosaic.version = 11 : i64} {
  func.func @_combined_embedding_kernel(%arg0: i32, %arg1: memref<8x128xf32, #tpu.memory_space<vmem>>, %arg2: memref<8x16xf32, #tpu.memory_space<vmem>>, %arg3: memref<16x128xf32, #tpu.memory_space<vmem>>, %arg4: memref<8x16xf32, #tpu.memory_space<vmem>>, %arg5: memref<16x128xf32, #tpu.memory_space<vmem>>, %arg6: memref<8x128xf32, #tpu.memory_space<vmem>>) attributes {dimension_semantics = [#tpu.dimension_semantics<parallel>], iteration_bounds = array<i64: 1>, scalar_prefetch = 0 : i64, scratch_operands = 0 : i64, tpu.core_type = #tpu.core_type<tc>, window_params = [{transform_indices = @transform_0, window_bounds = array<i64: 8, 128>}, {transform_indices = @transform_1, window_bounds = array<i64: 8, 16>}, {pipeline_mode = #tpu.pipeline_mode<synchronous>, transform_indices = @transform_2, window_bounds = array<i64: 16, 128>}, {transform_indices = @transform_3, window_bounds = array<i64: 8, 16>}, {pipeline_mode = #tpu.pipeline_mode<synchronous>, transform_indices = @transform_4, window_bounds = array<i64: 16, 128>}, {transform_indices = @transform_5, window_bounds = array<i64: 8, 128>}]} {
    %c0 = arith.constant 0 : index
    %c0_0 = arith.constant 0 : index
    %0 = vector.load %arg2[%c0, %c0_0] : memref<8x16xf32, #tpu.memory_space<vmem>>, vector<8x16xf32>
    %c0_1 = arith.constant 0 : index
    %c0_2 = arith.constant 0 : index
    %1 = vector.load %arg3[%c0_1, %c0_2] : memref<16x128xf32, #tpu.memory_space<vmem>>, vector<16x128xf32>
    %cst = arith.constant dense<0.000000e+00> : vector<8x128xf32>
    %2 = tpu.matmul %0, %1, %cst {dimension_numbers = #tpu.dot_dimension_numbers<[1], [0], [0], [1], [0, 0, 1, 1], [], []>} : vector<8x16xf32>, vector<16x128xf32>, vector<8x128xf32> -> vector<8x128xf32>
    %c0_3 = arith.constant 0 : index
    %c0_4 = arith.constant 0 : index
    %3 = vector.load %arg4[%c0_3, %c0_4] : memref<8x16xf32, #tpu.memory_space<vmem>>, vector<8x16xf32>
    %c0_5 = arith.constant 0 : index
    %c0_6 = arith.constant 0 : index
    %4 = vector.load %arg5[%c0_5, %c0_6] : memref<16x128xf32, #tpu.memory_space<vmem>>, vector<16x128xf32>
    %cst_7 = arith.constant dense<0.000000e+00> : vector<8x128xf32>
    %5 = tpu.matmul %3, %4, %cst_7 {dimension_numbers = #tpu.dot_dimension_numbers<[1], [0], [0], [1], [0, 0, 1, 1], [], []>} : vector<8x16xf32>, vector<16x128xf32>, vector<8x128xf32> -> vector<8x128xf32>
    %c0_8 = arith.constant 0 : index
    %c0_9 = arith.constant 0 : index
    %6 = vector.load %arg1[%c0_8, %c0_9] : memref<8x128xf32, #tpu.memory_space<vmem>>, vector<8x128xf32>
    %7 = arith.negf %2 : vector<8x128xf32>
    %8 = math.exp %7 : vector<8x128xf32>
    %cst_10 = arith.constant 1.000000e+00 : f32
    %9 = vector.broadcast %cst_10 : f32 to vector<8x128xf32>
    %10 = arith.addf %9, %8 : vector<8x128xf32>
    %11 = arith.divf %9, %10 : vector<8x128xf32>
    %12 = arith.mulf %2, %11 : vector<8x128xf32>
    %13 = arith.addf %6, %12 : vector<8x128xf32>
    %14 = arith.negf %5 : vector<8x128xf32>
    %15 = math.exp %14 : vector<8x128xf32>
    %cst_11 = arith.constant 1.000000e+00 : f32
    %16 = vector.broadcast %cst_11 : f32 to vector<8x128xf32>
    %17 = arith.addf %16, %15 : vector<8x128xf32>
    %18 = arith.divf %16, %17 : vector<8x128xf32>
    %19 = arith.mulf %5, %18 : vector<8x128xf32>
    %20 = arith.addf %13, %19 : vector<8x128xf32>
    %c0_12 = arith.constant 0 : index
    %c0_13 = arith.constant 0 : index
    %21 = vector.load %arg6[%c0_12, %c0_13] : memref<8x128xf32, #tpu.memory_space<vmem>>, vector<8x128xf32>
    tpu.vector_store %arg6[%c0_12, %c0_13], %20 {strides = array<i32>} : memref<8x128xf32, #tpu.memory_space<vmem>>, vector<8x128xf32>,
    return
  }
  func.func @transform_0(%arg0: i32) -> (i32, i32) {
    %c0_i32 = arith.constant 0 : i32
    %c0_i32_0 = arith.constant 0 : i32
    return %arg0, %c0_i32 : i32, i32
  }
  func.func @transform_1(%arg0: i32) -> (i32, i32) {
    %c0_i32 = arith.constant 0 : i32
    %c0_i32_0 = arith.constant 0 : i32
    return %arg0, %c0_i32 : i32, i32
  }
  func.func @transform_2(%arg0: i32) -> (i32, i32) {
    %c0_i32 = arith.constant 0 : i32
    %c0_i32_0 = arith.constant 0 : i32
    %c0_i32_1 = arith.constant 0 : i32
    return %c0_i32, %c0_i32_0 : i32, i32
  }
  func.func @transform_3(%arg0: i32) -> (i32, i32) {
    %c0_i32 = arith.constant 0 : i32
    %c0_i32_0 = arith.constant 0 : i32
    return %arg0, %c0_i32 : i32, i32
  }
  func.func @transform_4(%arg0: i32) -> (i32, i32) {
    %c0_i32 = arith.constant 0 : i32
    %c0_i32_0 = arith.constant 0 : i32
    %c0_i32_1 = arith.constant 0 : i32
    return %c0_i32, %c0_i32_0 : i32, i32
  }
  func.func @transform_5(%arg0: i32) -> (i32, i32) {
    %c0_i32 = arith.constant 0 : i32
    %c0_i32_0 = arith.constant 0 : i32
    return %arg0, %c0_i32 : i32, i32
  }
}

</mosaic_0001>

<bundles_post_ra>
// kernel: tile.53
= control target key start
LH: loop header
LB: loop body
LE: loop exit
PB: predicated region body
PF: predicated region fallthrough
CT: control target
= control target key end

     0   :  { %s22_s0 = inlined_call_operand.vmem [shape: f32[32], index: 0, kind: input, shape index: {}]   ;;  %s23_s1 = inlined_call_operand.vmem [shape: f32[4,32], index: 1, kind: output, shape index: {}]  }
   0x1   :  { %v4_v0 = vld [vmem:[%s22_s0] ss:$0 sm:$0xff] }
   0x2   :  { %5 = vst [vmem:[%s23_s1] sm:$0xf] %v4_v0 }

// kernel: mul.41
= control target key start
LH: loop header
LB: loop body
LE: loop exit
PB: predicated region body
PF: predicated region fallthrough
CT: control target
= control target key end

     0   :  { %vm8_vm0 = vcmask 261120   ;;  %s40_s8 = smov 32   ;;  %s41_s9 = smov 64   ;;  %vm14_vm1 = vcmask 1048320   ;;  %vm20_vm2 = vcmask 785920   ;;  %vm26_vm3 = vcmask 523520   ;;  %s58_s0 = inlined_call_operand.vmem [shape: f32[4,32], index: 0, kind: input, shape index: {}]   ;;  %s59_s1 = inlined_call_operand.vmem [shape: f32[128], index: 1, kind: output, shape index: {}]  }
   0x1   :  { %v5_v0 = vld [vmem:[%s58_s0] sm:$0xf]  ;;  %s39_s0 = smov 96  }
   0x2   :  { %6 = vst [vmem:[#allocation1] sm:$0xf] %v5_v0 }
   0x9   :  { %v11_v1 = vld [vmem:[#allocation1 + $0x3] sm:$0x1]   ;;  %v23_v2 = vld [vmem:[#allocation1 + $0x1] sm:$0x1]   ;;  %v7_v3 = vld [vmem:[#allocation1] sm:$0x1]  }
   0xa   :  { %12 = vrot.lane.b32.xlu0 %v11_v1, %s39_s0  ;;  %24 = vrot.lane.b32.xlu1 %v23_v2, %s40_s8  ;;  %v17_v4 = vld [vmem:[#allocation1 + $0x2] sm:$0x1]   ;;  %9 = vst.msk [vmem:[#allocation0] sm:$0x1] %vm8_vm0, %v7_v3  }
   0xe   :  { %18 = vrot.lane.b32.xlu0 %v17_v4, %s41_s9 }
  0x7c   :  { %v13_v5 = vpop.permute.xlu0 %12   ;;  %v25_v6 = vpop.permute.xlu1 %24  }
  0x7d   :  { %15 = vst.msk [vmem:[#allocation0] sm:$0x1] %vm14_vm1, %v13_v5  }
  0x80   :  { %v19_v7 = vpop.permute.xlu0 %18  }
  0x81   :  { %21 = vst.msk [vmem:[#allocation0] sm:$0x1] %vm20_vm2, %v19_v7  }
  0x82   :  { %27 = vst.msk [vmem:[#allocation0] sm:$0x1] %vm26_vm3, %v25_v6  }
  0x89   :  { %v32_v8 = vld [vmem:[#allocation0] sm:$0x1] }
  0x8a   :  { %35 = vst [vmem:[%s59_s1] sm:$0x1] %v32_v8 }

// kernel: _forward_impl.1
= control target key start
LH: loop header
LB: loop body
LE: loop exit
PB: predicated region body
PF: predicated region fallthrough
CT: control target
= control target key end

     0   :  { %v229_v0 = vmov 0.0   ;;  %vm23_vm0 = vcmask 130048   ;;  %vm230_vm1 = vmmov 0   ;;  %s285_s2 = inlined_call_operand.vmem [shape: f32[16,128], index: 2, kind: input, shape index: {}]   ;;  %s286_s4 = inlined_call_operand.vmem [shape: f32[16,128], index: 4, kind: input, shape index: {}]   ;;  %s287_s1 = inlined_call_operand.vmem [shape: f32[8,16], index: 1, kind: input, shape index: {}]   ;;  %s288_s3 = inlined_call_operand.vmem [shape: f32[8,16], index: 3, kind: input, shape index: {}]   ;;  %s289_s0 = inlined_call_operand.vmem [shape: f32[8,128], index: 0, kind: input, shape index: {}, may-alias: {0,5}]   ;;  %s290_s5 = inlined_call_operand.vmem [shape: f32[8,128], index: 5, kind: output, shape index: {}, may-alias: {0,5}]  }
   0x1   :  { %205 = vmatprep.subr.mxu0 %v229_v0  ;;  %212 = vmatprep.subr.mxu1 %v229_v0  ;;  %v22_v1 = vld [vmem:[%s285_s2 + $0x8] sm:$0xff]  ;;  %v21_v3 = vld [vmem:[%s285_s2] sm:$0xff] }
   0x2   :  { %v99_v2 = vld [vmem:[%s286_s4 + $0x8] sm:$0xff]  ;;  %206 = vmatpush3.msra.mxu0 %v22_v1  ;;  %v98_v4 = vld [vmem:[%s286_s4] sm:$0xff]  ;;  %209 = vmatprep.mubr.msk.f32.mxu0 %vm230_vm1, %v229_v0 }
   0x3   :  { %213 = vmatpush3.msra.mxu1 %v99_v2  ;;  %207 = vmatprep.subr.mxu0 %v229_v0  ;;  %v20_v5 = vld [vmem:[%s287_s1] sm:$0xff] }
   0x4   :  { %214 = vmatprep.subr.mxu1 %v229_v0  ;;  %v97_v6 = vld [vmem:[%s288_s3] sm:$0xff]  ;;  %208 = vmatpush3.msra.mxu0 %v21_v3 }
   0x5   :  { %215 = vmatpush3.msra.mxu1 %v98_v4  ;;  %216 = vmatprep.mubr.msk.f32.mxu1 %vm230_vm1, %v229_v0  ;;  %v173_v18 = vld [vmem:[%s289_s0] sm:$0xff] }
   0x6   :  { %210 = vmatmul.mubr.msk.f32.vlgmr.msra.gmra.mxu0 %vm23_vm0, %v20_v5  ;;  %217 = vmatmul.mubr.msk.f32.vlgmr.msra.gmra.mxu1 %vm23_vm0, %v97_v6 }
  0xc6   :  { %v93_v7 = vpop.f32.mrf.mxu0  ;;  %v169_v8 = vpop.f32.mrf.mxu1 }
  0xc7   :  { %v197_v9 = vmul.f32 -1.442695, %v93_v7  ;;  %v198_v10 = vmul.f32 -1.442695, %v169_v8 }
  0xc8   :  { %v211_v11 = vpop.f32.mrf.mxu0  ;;  %v218_v12 = vpop.f32.mrf.mxu1 }
  0xc9   :  { %221 = vpow2.f32 %v197_v9 }
  0xca   :  { %223 = vpow2.f32 %v198_v10 }
  0xd6   :  { %v222_v13 = vpop.eup %221 }
  0xd7   :  { %v224_v14 = vpop.eup %223  ;;  %v177_v15 = vadd.f32 1.0, %v222_v13 }
  0xd8   :  { %v185_v16 = vadd.f32 1.0, %v224_v14 }
  0xd9   :  { %225 = vrcp.f32 %v177_v15 }
  0xda   :  { %227 = vrcp.f32 %v185_v16 }
  0xe6   :  { %v226_v17 = vpop.eup %225 }
  0xe7   :  { %v228_v19 = vpop.eup %227  ;;  %v180_v20 = vmul.f32 %v226_v17, %v93_v7 }
  0xe8   :  { %v188_v22 = vmul.f32 %v228_v19, %v169_v8 }
  0xe9   :  { %v181_v21 = vadd.f32 %v180_v20, %v173_v18 }
  0xeb   :  { %v189_v23 = vadd.f32 %v188_v22, %v181_v21 }
  0xed   :  { %190 = vst [vmem:[%s290_s5] sm:$0xff] %v189_v23 }

</bundles_post_ra>
